<compile_context>
chip_gen: v5e
topology: v5e:2x2
jax: 0.10.0
libtpu: 0.0.40
codegen_flags: <defaults>
</compile_context>

<pallas_src>
import functools

import jax
import jax.numpy as jnp
from jax.experimental import pallas as pl
from jax.experimental.pallas import tpu as pltpu


def _round_up(x, m):
    return ((x + m - 1) // m) * m


def attention_gru_cell_kernel(
    fact_ref, c_ref, g_ref,        # per-batch-tile activations
    wf_ref, bf_ref,                # fused fact-path weights/bias: (In, 2Hp), (1, 2Hp)
    wc_ref, bu_ref,                # fused C-path weights (Hp, 2Hp) + h-half bias (1, Hp)
    h_ref,                         # output (TB, Hp), float32
    *, hp,
):
    fact = fact_ref[...]           # (TB, In)
    C = c_ref[...]                 # (TB, Hp)   (zero-padded beyond H)
    g = g_ref[...].astype(jnp.float32)   # (TB, 1)  broadcasts over lanes

    # Two fused MXU matmuls instead of four, f32 accumulation.
    #   xf = [fact@Wr + bwr + bur | fact@W + bw]
    #   xc = [C@Ur                | C@U        ]
    xf = jnp.dot(fact, wf_ref[...], preferred_element_type=jnp.float32) + bf_ref[...]
    xc = jnp.dot(C, wc_ref[...], preferred_element_type=jnp.float32)

    # Static, vreg-aligned split at hp (a multiple of 128).
    r = jax.nn.sigmoid(xf[:, :hp] + xc[:, :hp])
    h_tilda = jnp.tanh(xf[:, hp:] + r * (xc[:, hp:] + bu_ref[...]))

    # h = C + g * (h_tilda - C)   (== g*h_tilda + (1-g)*C; padded lanes stay 0)
    Cf = C.astype(jnp.float32)
    h_ref[...] = Cf + g * (h_tilda - Cf)


def pack_params(params, *, dtype=jnp.float32):
    """Build the fused / padded weights ONCE (hoisted out of the forward path)."""
    wr, bwr, ur, bur, w, bw, u, bu = params
    In, H = wr.shape
    Hp = _round_up(H, 128)

    def pad_to(m, rows, cols):
        return jnp.pad(m, ((0, rows - m.shape[0]), (0, cols - m.shape[1])))

    # Fused fact-path weights (In, 2Hp): r-path in the first Hp columns.
    wf = jnp.concatenate([pad_to(wr, In, Hp), pad_to(w, In, Hp)], axis=1).astype(dtype)
    # Fused C-path weights (Hp, 2Hp): rows padded to Hp so K matches the padded C tile.
    wc = jnp.concatenate([pad_to(ur, Hp, Hp), pad_to(u, Hp, Hp)], axis=1).astype(dtype)
    # Fused fact-path bias: [bwr + bur | bw].  bu stays separate (inside r * (...)).
    bf = (
        jnp.concatenate([jnp.pad(bwr + bur, (0, Hp - H)), jnp.pad(bw, (0, Hp - H))])
        .reshape(1, 2 * Hp)
        .astype(jnp.float32)
    )
    bup = jnp.pad(bu, (0, Hp - H)).reshape(1, Hp).astype(jnp.float32)
    return {"wf": wf, "bf": bf, "wc": wc, "bu": bup,
            "In": In, "H": H, "Hp": Hp, "dtype": dtype}


def attention_gru_cell(fact, C, g, packed):
    """fact: (B, In), C: (B, H), g: (B,) -> h: (B, H) float32."""
    B = fact.shape[0]
    In, H, Hp = packed["In"], packed["H"], packed["Hp"]
    dtype = packed["dtype"]

    # Batch tiling: multiple of 8 sublanes, up to 512 rows per tile.  When the
    # batch needs more than one tile we make at least 2 grid steps so the
    # "parallel" axis can shard across v7x's two TensorCores.
    rb = _round_up(B, 8)
    if rb > 512:
        tb = 512
    elif rb > 8:
        tb = _round_up(pl.cdiv(rb, 2), 8)
    else:
        tb = rb
    Bp = _round_up(B, tb)
    pad_b = Bp - B
    pad_h = Hp - H

    fact_p = fact.astype(dtype)
    C_p = C.astype(dtype)
    g_p = g.astype(dtype).reshape(B, 1)
    if pad_h or pad_b:
        C_p = jnp.pad(C_p, ((0, pad_b), (0, pad_h)))
    if pad_b:
        fact_p = jnp.pad(fact_p, ((0, pad_b), (0, 0)))
        g_p = jnp.pad(g_p, ((0, pad_b), (0, 0)))

    grid = (Bp // tb,)
    out = pl.pallas_call(
        functools.partial(attention_gru_cell_kernel, hp=Hp),
        out_shape=jax.ShapeDtypeStruct((Bp, Hp), jnp.float32),
        grid_spec=pltpu.PrefetchScalarGridSpec(
            num_scalar_prefetch=0,
            grid=grid,
            in_specs=[
                pl.BlockSpec((tb, In), lambda i: (i, 0)),        # fact tile
                pl.BlockSpec((tb, Hp), lambda i: (i, 0)),        # C tile
                pl.BlockSpec((tb, 1), lambda i: (i, 0)),         # g tile
                pl.BlockSpec((In, 2 * Hp), lambda i: (0, 0)),    # fused fact weights (resident)
                pl.BlockSpec((1, 2 * Hp), lambda i: (0, 0)),     # fused fact bias    (resident)
                pl.BlockSpec((Hp, 2 * Hp), lambda i: (0, 0)),    # fused C weights    (resident)
                pl.BlockSpec((1, Hp), lambda i: (0, 0)),         # bu                 (resident)
            ],
            out_specs=pl.BlockSpec((tb, Hp), lambda i: (i, 0)),
        ),
        compiler_params=pltpu.CompilerParams(
            dimension_semantics=("parallel",),
        ),
    )(fact_p, C_p, g_p, packed["wf"], packed["bf"], packed["wc"], packed["bu"])

    return out[:B, :H]


def xavier_normal(key, shape):
    # shape = (in_features, out_features) [already transposed for x @ W]
    fan_in, fan_out = shape[0], shape[1]
    std = (2.0 / (fan_in + fan_out)) ** 0.5
    return std * jax.random.normal(key, shape, dtype=jnp.float32)


def make_params(key, input_size, hidden_size):
    ks = jax.random.split(key, 8)
    wr = xavier_normal(ks[0], (input_size, hidden_size))
    ur = xavier_normal(ks[1], (hidden_size, hidden_size))
    w = xavier_normal(ks[2], (input_size, hidden_size))
    u = xavier_normal(ks[3], (hidden_size, hidden_size))
    bwr = 0.01 * jax.random.normal(ks[4], (hidden_size,), dtype=jnp.float32)
    bur = 0.01 * jax.random.normal(ks[5], (hidden_size,), dtype=jnp.float32)
    bw = 0.01 * jax.random.normal(ks[6], (hidden_size,), dtype=jnp.float32)
    bu = 0.01 * jax.random.normal(ks[7], (hidden_size,), dtype=jnp.float32)
    return (wr, bwr, ur, bur, w, bw, u, bu)


def reference(fact, C, g, params):
    wr, bwr, ur, bur, w, bw, u, bu = params
    r = jax.nn.sigmoid(fact @ wr + bwr + C @ ur + bur)
    h_tilda = jnp.tanh(fact @ w + bw + r * (C @ u + bu))
    g = g[:, None]
    return g * h_tilda + (1.0 - g) * C


if __name__ == "__main__":
    input_size = 64
    hidden_size = 80   # matches the module's global hidden_size
    batch = 8

    key = jax.random.PRNGKey(0)
    k_fact, k_c, k_g, k_p = jax.random.split(key, 4)

    fact = jax.random.normal(k_fact, (batch, input_size), dtype=jnp.float32)
    C = jax.random.normal(k_c, (batch, hidden_size), dtype=jnp.float32)
    g = jax.random.uniform(k_g, (batch,), dtype=jnp.float32)

    params = make_params(k_p, input_size, hidden_size)
    packed = pack_params(params, dtype=jnp.float32)   # pack/pad weights once

    h = attention_gru_cell(fact, C, g, packed)
    h = jax.block_until_ready(h)

    h_ref = reference(fact, C, g, params)
    assert h.shape == (batch, hidden_size)
    assert jnp.allclose(h, h_ref, atol=1e-4, rtol=1e-4), float(
        jnp.max(jnp.abs(h - h_ref))
    )

    print("KERNEL_OK")
</pallas_src>

<mosaic_0001>
module attributes {stable_mosaic.version = 11 : i64} {
  func.func @attention_gru_cell_kernel(%arg0: i32, %arg1: memref<8x64xf32, #tpu.memory_space<vmem>>, %arg2: memref<8x128xf32, #tpu.memory_space<vmem>>, %arg3: memref<8x1xf32, #tpu.memory_space<vmem>>, %arg4: memref<64x256xf32, #tpu.memory_space<vmem>>, %arg5: memref<1x256xf32, #tpu.memory_space<vmem>>, %arg6: memref<128x256xf32, #tpu.memory_space<vmem>>, %arg7: memref<1x128xf32, #tpu.memory_space<vmem>>, %arg8: memref<8x128xf32, #tpu.memory_space<vmem>>) attributes {dimension_semantics = [#tpu.dimension_semantics<parallel>], iteration_bounds = array<i64: 1>, scalar_prefetch = 0 : i64, scratch_operands = 0 : i64, tpu.core_type = #tpu.core_type<tc>, window_params = [{transform_indices = @transform_0, window_bounds = array<i64: 8, 64>}, {transform_indices = @transform_1, window_bounds = array<i64: 8, 128>}, {transform_indices = @transform_2, window_bounds = array<i64: 8, 1>}, {pipeline_mode = #tpu.pipeline_mode<synchronous>, transform_indices = @transform_3, window_bounds = array<i64: 64, 256>}, {pipeline_mode = #tpu.pipeline_mode<synchronous>, transform_indices = @transform_4, window_bounds = array<i64: 1, 256>}, {pipeline_mode = #tpu.pipeline_mode<synchronous>, transform_indices = @transform_5, window_bounds = array<i64: 128, 256>}, {pipeline_mode = #tpu.pipeline_mode<synchronous>, transform_indices = @transform_6, window_bounds = array<i64: 1, 128>}, {transform_indices = @transform_7, window_bounds = array<i64: 8, 128>}]} {
    %c0 = arith.constant 0 : index
    %c0_0 = arith.constant 0 : index
    %0 = vector.load %arg1[%c0, %c0_0] : memref<8x64xf32, #tpu.memory_space<vmem>>, vector<8x64xf32>
    %c0_1 = arith.constant 0 : index
    %c0_2 = arith.constant 0 : index
    %1 = vector.load %arg2[%c0_1, %c0_2] : memref<8x128xf32, #tpu.memory_space<vmem>>, vector<8x128xf32>
    %c0_3 = arith.constant 0 : index
    %c0_4 = arith.constant 0 : index
    %2 = vector.load %arg3[%c0_3, %c0_4] : memref<8x1xf32, #tpu.memory_space<vmem>>, vector<8x1xf32>
    %c0_5 = arith.constant 0 : index
    %c0_6 = arith.constant 0 : index
    %3 = vector.load %arg4[%c0_5, %c0_6] : memref<64x256xf32, #tpu.memory_space<vmem>>, vector<64x256xf32>
    %cst = arith.constant dense<0.000000e+00> : vector<8x256xf32>
    %4 = tpu.matmul %0, %3, %cst {dimension_numbers = #tpu.dot_dimension_numbers<[1], [0], [0], [1], [0, 0, 1, 1], [], []>} : vector<8x64xf32>, vector<64x256xf32>, vector<8x256xf32> -> vector<8x256xf32>
    %c0_7 = arith.constant 0 : index
    %c0_8 = arith.constant 0 : index
    %5 = vector.load %arg5[%c0_7, %c0_8] : memref<1x256xf32, #tpu.memory_space<vmem>>, vector<1x256xf32>
    %6 = vector.broadcast %5 : vector<1x256xf32> to vector<8x256xf32>
    %7 = arith.addf %4, %6 : vector<8x256xf32>
    %c0_9 = arith.constant 0 : index
    %c0_10 = arith.constant 0 : index
    %8 = vector.load %arg6[%c0_9, %c0_10] : memref<128x256xf32, #tpu.memory_space<vmem>>, vector<128x256xf32>
    %cst_11 = arith.constant dense<0.000000e+00> : vector<8x256xf32>
    %9 = tpu.matmul %1, %8, %cst_11 {dimension_numbers = #tpu.dot_dimension_numbers<[1], [0], [0], [1], [0, 0, 1, 1], [], []>} : vector<8x128xf32>, vector<128x256xf32>, vector<8x256xf32> -> vector<8x256xf32>
    %10 = vector.extract_strided_slice %7 {offsets = [0, 0], sizes = [8, 128], strides = [1, 1]} : vector<8x256xf32> to vector<8x128xf32>
    %11 = vector.extract_strided_slice %9 {offsets = [0, 0], sizes = [8, 128], strides = [1, 1]} : vector<8x256xf32> to vector<8x128xf32>
    %12 = arith.addf %10, %11 : vector<8x128xf32>
    %13 = arith.negf %12 : vector<8x128xf32>
    %14 = math.exp %13 : vector<8x128xf32>
    %cst_12 = arith.constant 1.000000e+00 : f32
    %15 = vector.broadcast %cst_12 : f32 to vector<8x128xf32>
    %16 = arith.addf %15, %14 : vector<8x128xf32>
    %17 = arith.divf %15, %16 : vector<8x128xf32>
    %18 = vector.extract_strided_slice %7 {offsets = [0, 128], sizes = [8, 128], strides = [1, 1]} : vector<8x256xf32> to vector<8x128xf32>
    %19 = vector.extract_strided_slice %9 {offsets = [0, 128], sizes = [8, 128], strides = [1, 1]} : vector<8x256xf32> to vector<8x128xf32>
    %c0_13 = arith.constant 0 : index
    %c0_14 = arith.constant 0 : index
    %20 = vector.load %arg7[%c0_13, %c0_14] : memref<1x128xf32, #tpu.memory_space<vmem>>, vector<1x128xf32>
    %21 = vector.broadcast %20 : vector<1x128xf32> to vector<8x128xf32>
    %22 = arith.addf %19, %21 : vector<8x128xf32>
    %23 = arith.mulf %17, %22 : vector<8x128xf32>
    %24 = arith.addf %18, %23 : vector<8x128xf32>
    %25 = math.tanh %24 : vector<8x128xf32>
    %26 = arith.subf %25, %1 : vector<8x128xf32>
    %27 = vector.broadcast %2 : vector<8x1xf32> to vector<8x128xf32>
    %28 = arith.mulf %27, %26 : vector<8x128xf32>
    %29 = arith.addf %1, %28 : vector<8x128xf32>
    %c0_15 = arith.constant 0 : index
    %c0_16 = arith.constant 0 : index
    %30 = vector.load %arg8[%c0_15, %c0_16] : memref<8x128xf32, #tpu.memory_space<vmem>>, vector<8x128xf32>
    tpu.vector_store %arg8[%c0_15, %c0_16], %29 {strides = array<i32>} : memref<8x128xf32, #tpu.memory_space<vmem>>, vector<8x128xf32>,
    return
  }
  func.func @transform_0(%arg0: i32) -> (i32, i32) {
    %c0_i32 = arith.constant 0 : i32
    %c0_i32_0 = arith.constant 0 : i32
    return %arg0, %c0_i32 : i32, i32
  }
  func.func @transform_1(%arg0: i32) -> (i32, i32) {
    %c0_i32 = arith.constant 0 : i32
    %c0_i32_0 = arith.constant 0 : i32
    return %arg0, %c0_i32 : i32, i32
  }
  func.func @transform_2(%arg0: i32) -> (i32, i32) {
    %c0_i32 = arith.constant 0 : i32
    %c0_i32_0 = arith.constant 0 : i32
    return %arg0, %c0_i32 : i32, i32
  }
  func.func @transform_3(%arg0: i32) -> (i32, i32) {
    %c0_i32 = arith.constant 0 : i32
    %c0_i32_0 = arith.constant 0 : i32
    %c0_i32_1 = arith.constant 0 : i32
    return %c0_i32, %c0_i32_0 : i32, i32
  }
  func.func @transform_4(%arg0: i32) -> (i32, i32) {
    %c0_i32 = arith.constant 0 : i32
    %c0_i32_0 = arith.constant 0 : i32
    %c0_i32_1 = arith.constant 0 : i32
    return %c0_i32, %c0_i32_0 : i32, i32
  }
  func.func @transform_5(%arg0: i32) -> (i32, i32) {
    %c0_i32 = arith.constant 0 : i32
    %c0_i32_0 = arith.constant 0 : i32
    %c0_i32_1 = arith.constant 0 : i32
    return %c0_i32, %c0_i32_0 : i32, i32
  }
  func.func @transform_6(%arg0: i32) -> (i32, i32) {
    %c0_i32 = arith.constant 0 : i32
    %c0_i32_0 = arith.constant 0 : i32
    %c0_i32_1 = arith.constant 0 : i32
    return %c0_i32, %c0_i32_0 : i32, i32
  }
  func.func @transform_7(%arg0: i32) -> (i32, i32) {
    %c0_i32 = arith.constant 0 : i32
    %c0_i32_0 = arith.constant 0 : i32
    return %arg0, %c0_i32 : i32, i32
  }
}

</mosaic_0001>

<bundles_post_ra>
// kernel: tpu_custom_call.1
= control target key start
LH: loop header
LB: loop body
LE: loop exit
PB: predicated region body
PF: predicated region fallthrough
CT: control target
= control target key end

     0   :  { %12 = vsyncpa [#allocation3], 0  ;;  %s461_s0 = inlined_call_operand.vmem [shape: f32[8,64], index: 0, kind: input, shape index: {}]   ;;  %s462_s1 = inlined_call_operand.hbm [shape: f32[8,128], index: 1, kind: input, shape index: {}]   ;;  %s463_s2 = inlined_call_operand.vmem [shape: f32[8,1], index: 2, kind: input, shape index: {}]   ;;  %s464_s3 = inlined_call_operand.hbm [shape: f32[64,256], index: 3, kind: input, shape index: {}]   ;;  %s465_s4 = inlined_call_operand.vmem [shape: f32[1,256], index: 4, kind: input, shape index: {}]   ;;  %s466_s5 = inlined_call_operand.hbm [shape: f32[128,256], index: 5, kind: input, shape index: {}]   ;;  %s467_s6 = inlined_call_operand.vmem [shape: f32[1,128], index: 6, kind: input, shape index: {}]   ;;  %s468_s7 = inlined_call_operand.hbm [shape: f32[8,128], index: 7, kind: output, shape index: {}]  }
   0x1   :  { %13 = vsyncpa [#allocation6], 0  ;;  %s34_s26 = sshll.u32 %s464_s3, 4  ;;  %s35_s26 = int_to_ptr.hbm [resolvable:$true] %s34_s26 }
   0x2   :  { %14 = vsyncpa [#allocation4], 0  ;;  %s388_s27 = smov [#allocation5]   ;;  %s22_s8 = sshll.u32 %s462_s1, 4  ;;  %s23_s8 = int_to_ptr.hbm [resolvable:$true] %s22_s8 }
   0x3   :  { %s36_s28 = sshll.u32 %s388_s27, 4  ;;  %s389_s9 = smov 256   ;;  %s37_s28 = int_to_ptr.vmem [resolvable:$true] %s36_s28 }
   0x4   :  { %s390_s10 = smov 16   ;;  %s391_s11 = smov [#allocation2]  }
   0x5   :  { %42 = dma.hbm_to_vmem [thread:$0]  %s35_s26, 2048, %s37_s28, [#allocation6], %s389_s9, %s389_s9, %s390_s10  }
   0x6   :  { %s24_s12 = sshll.u32 %s391_s11, 4  ;;  %s49_s15 = sshll.u32 %s466_s5, 4  ;;  %s25_s12 = int_to_ptr.vmem [resolvable:$true] %s24_s12  ;;  %s50_s15 = int_to_ptr.hbm [resolvable:$true] %s49_s15 }
   0x7   :  { %27 = dma.hbm_to_vmem [thread:$0]  %s23_s8, 128, %s25_s12, [#allocation3]  }
   0x8   :  { %s392_s3 = smov [#allocation7]  }
   0x9   :  { %s51_s16 = sshll.u32 %s392_s3, 4  ;;  %s52_s16 = int_to_ptr.vmem [resolvable:$true] %s51_s16 }
   0xa   :  { %57 = dma.hbm_to_vmem [thread:$0]  %s50_s15, 4096, %s52_s16, [#allocation6], %s389_s9, %s389_s9, %s390_s10  }
   0xb   :  { %382 = dma.done.wait [#allocation3], 128  }
   0xc   :  { %383 = vsyncadd [#allocation3], 4294967168 }
   0xd   :  { %384 = dma.done.wait [#allocation6], 6144  }
   0xe   :  { %385 = vsyncadd [#allocation6], 4294961152  ;;  %v171_v0 = vld [vmem:[#allocation7 + $0xf0] sm:$0xff]  ;;  %v169_v1 = vld [vmem:[#allocation7 + $0xe0] sm:$0xff]  ;;  %v393_v13 = vmov 0   ;;  %vm97_vm0 = vcmask 523264  }
   0xf   :  { %173 = vmatpush.msra.mxu2 %v171_v0  ;;  %v167_v2 = vld [vmem:[#allocation7 + $0xd0] sm:$0xff]  ;;  %v165_v4 = vld [vmem:[#allocation7 + $0xc0] sm:$0xff]  ;;  %v172_v8 = vld [vmem:[#allocation7 + $0xf8] sm:$0xff]  ;;  %278 = vset.pattern.permute.xlu0 %v393_v13  ;;  %s257_s23 = sshll.u32 %s468_s7, 4  ;;  %s258_s23 = int_to_ptr.hbm [resolvable:$true] %s257_s23 }
  0x10   :  { %v89_v3 = vld [vmem:[#allocation5 + $0x70] sm:$0xff]  ;;  %v87_v5 = vld [vmem:[#allocation5 + $0x60] sm:$0xff]  ;;  %193 = vmatpush.msra.mxu3 %v172_v8  ;;  %v170_v10 = vld [vmem:[#allocation7 + $0xe8] sm:$0xff] }
  0x11   :  { %174 = vmatpush.msra.mxu2 %v169_v1  ;;  %109 = vmatpush.msra.mxu0 %v89_v3  ;;  %v85_v6 = vld [vmem:[#allocation5 + $0x50] sm:$0xff]  ;;  %v83_v9 = vld [vmem:[#allocation5 + $0x40] sm:$0xff]  ;;  %v168_v12 = vld [vmem:[#allocation7 + $0xd8] sm:$0xff] }
  0x12   :  { %v163_v7 = vld [vmem:[#allocation7 + $0xb0] sm:$0xff]  ;;  %v161_v11 = vld [vmem:[#allocation7 + $0xa0] sm:$0xff]  ;;  %194 = vmatpush.msra.mxu3 %v170_v10  ;;  %v166_v16 = vld [vmem:[#allocation7 + $0xc8] sm:$0xff] }
  0x13   :  { %175 = vmatpush.msra.mxu2 %v167_v2  ;;  %110 = vmatpush.msra.mxu0 %v87_v5  ;;  %v81_v14 = vld [vmem:[#allocation5 + $0x30] sm:$0xff]  ;;  %v79_v17 = vld [vmem:[#allocation5 + $0x20] sm:$0xff]  ;;  %v164_v19 = vld [vmem:[#allocation7 + $0xb8] sm:$0xff] }
  0x14   :  { %v159_v15 = vld [vmem:[#allocation7 + $0x90] sm:$0xff]  ;;  %195 = vmatpush.msra.mxu3 %v168_v12  ;;  %v157_v18 = vld [vmem:[#allocation7 + $0x80] sm:$0xff]  ;;  %v90_v20 = vld [vmem:[#allocation5 + $0x78] sm:$0xff] }
  0x15   :  { %176 = vmatpush.msra.mxu2 %v165_v4  ;;  %111 = vmatpush.msra.mxu0 %v85_v6  ;;  %v77_v21 = vld [vmem:[#allocation5 + $0x10] sm:$0xff]  ;;  %v88_v22 = vld [vmem:[#allocation5 + $0x68] sm:$0xff]  ;;  %v75_v25 = vld [vmem:[#allocation5] sm:$0xff] }
  0x16   :  { %196 = vmatpush.msra.mxu3 %v166_v16  ;;  %v155_v23 = vld [vmem:[#allocation7 + $0x70] sm:$0xff]  ;;  %v162_v24 = vld [vmem:[#allocation7 + $0xa8] sm:$0xff]  ;;  %129 = vmatpush.msra.mxu1 %v90_v20  ;;  %v86_v26 = vld [vmem:[#allocation5 + $0x58] sm:$0xff] }
  0x17   :  { %177 = vmatpush.msra.mxu2 %v163_v7  ;;  %112 = vmatpush.msra.mxu0 %v83_v9  ;;  %v153_v27 = vld [vmem:[#allocation7 + $0x60] sm:$0xff]  ;;  %v72_v28 = vld [vmem:[%s461_s0] sm:$0xff]  ;;  %v84_v30 = vld [vmem:[#allocation5 + $0x48] sm:$0xff] }
  0x18   :  { %197 = vmatpush.msra.mxu3 %v164_v19  ;;  %130 = vmatpush.msra.mxu1 %v88_v22  ;;  %v160_v29 = vld [vmem:[#allocation7 + $0x98] sm:$0xff]  ;;  %v151_v31 = vld [vmem:[#allocation7 + $0x50] sm:$0xff]  ;;  %v158_v33 = vld [vmem:[#allocation7 + $0x88] sm:$0xff] }
  0x19   :  { %178 = vmatpush.msra.mxu2 %v161_v11  ;;  %113 = vmatpush.msra.mxu0 %v81_v14  ;;  %v74_v32 = vld [vmem:[%s463_s2] sm:$0xff]  ;;  %v149_v35 = vld [vmem:[#allocation7 + $0x40] sm:$0xff]  ;;  %v80_v37 = vld [vmem:[#allocation5 + $0x28] sm:$0xff] }
  0x1a   :  { %198 = vmatpush.msra.mxu3 %v162_v24  ;;  %131 = vmatpush.msra.mxu1 %v86_v26  ;;  %v82_v34 = vld [vmem:[#allocation5 + $0x38] sm:$0xff]  ;;  %v147_v38 = vld [vmem:[#allocation7 + $0x30] sm:$0xff]  ;;  %v154_v39 = vld [vmem:[#allocation7 + $0x68] sm:$0xff] }
  0x1b   :  { %179 = vmatpush.msra.mxu2 %v159_v15  ;;  %114 = vmatpush.msra.mxu0 %v79_v17  ;;  %v156_v36 = vld [vmem:[#allocation7 + $0x78] sm:$0xff]  ;;  %v145_v41 = vld [vmem:[#allocation7 + $0x20] sm:$0xff]  ;;  %v76_v43 = vld [vmem:[#allocation5 + $0x8] sm:$0xff] }
  0x1c   :  { %199 = vmatpush.msra.mxu3 %v160_v29  ;;  %132 = vmatpush.msra.mxu1 %v84_v30  ;;  %v78_v40 = vld [vmem:[#allocation5 + $0x18] sm:$0xff]  ;;  %v143_v44 = vld [vmem:[#allocation7 + $0x10] sm:$0xff]  ;;  %v150_v45 = vld [vmem:[#allocation7 + $0x48] sm:$0xff] }
  0x1d   :  { %180 = vmatpush.msra.mxu2 %v157_v18  ;;  %115 = vmatpush.msra.mxu0 %v77_v21  ;;  %v152_v42 = vld [vmem:[#allocation7 + $0x58] sm:$0xff]  ;;  %v141_v46 = vld [vmem:[#allocation7] sm:$0xff]  ;;  %v146_v49 = vld [vmem:[#allocation7 + $0x28] sm:$0xff] }
  0x1e   :  { %244 = vperm.xlu0 %278, %v74_v32   ;;  %200 = vmatpush.msra.mxu3 %v158_v33  ;;  %v73_v47 = vld [vmem:[#allocation2] sm:$0xff]  ;;  %v142_v51 = vld [vmem:[#allocation7 + $0x8] sm:$0xff] }
  0x1f   :  { %181 = vmatpush.msra.mxu2 %v155_v23  ;;  %116 = vmatpush.msra.mxu0 %v75_v25  ;;  %v148_v48 = vld [vmem:[#allocation7 + $0x38] sm:$0xff] }
  0x20   :  { %268 = vmatmul.msk.f32.vlgmr.msra.gmra.mxu0 %vm97_vm0, %v72_v28  ;;  %133 = vmatpush.msra.mxu1 %v82_v34  ;;  %v144_v50 = vld [vmem:[#allocation7 + $0x18] sm:$0xff] }
  0x21   :  { %182 = vmatpush.msra.mxu2 %v153_v27  ;;  %201 = vmatpush.msra.mxu3 %v156_v36  ;;  %v91_v52 = vld [vmem:[%s465_s4] sm:$0x3]  ;;  %s394_s4 = smov [#allocation8]  }
  0x22   :  { %134 = vmatpush.msra.mxu1 %v80_v37  ;;  %v93_v53 = vperm.slane %v91_v52, 0  ;;  %v279_v0 = vld [vmem:[%s467_s6] ss:$0 sm:$0xff]  ;;  %v94_v5 = vperm.slane %v91_v52, 1  ;;  %s255_s6 = sshll.u32 %s394_s4, 4  ;;  %s256_s6 = int_to_ptr.vmem [resolvable:$true] %s255_s6 }
  0x23   :  { %183 = vmatpush.msra.mxu2 %v151_v31  ;;  %202 = vmatpush.msra.mxu3 %v154_v39 }
  0x24   :  { %135 = vmatpush.msra.mxu1 %v78_v40 }
  0x25   :  { %184 = vmatpush.msra.mxu2 %v149_v35  ;;  %203 = vmatpush.msra.mxu3 %v152_v42 }
  0x26   :  { %136 = vmatpush.msra.mxu1 %v76_v43 }
  0x27   :  { %185 = vmatpush.msra.mxu2 %v147_v38  ;;  %269 = vmatmul.msk.f32.vlgmr.msra.gmra.mxu1 %vm97_vm0, %v72_v28 }
  0x28   :  { %204 = vmatpush.msra.mxu3 %v150_v45 }
  0x29   :  { %186 = vmatpush.msra.mxu2 %v145_v41 }
  0x2a   :  { %205 = vmatpush.msra.mxu3 %v148_v48 }
  0x2b   :  { %187 = vmatpush.msra.mxu2 %v143_v44 }
  0x2c   :  { %206 = vmatpush.msra.mxu3 %v146_v49 }
  0x2d   :  { %188 = vmatpush.msra.mxu2 %v141_v46 }
  0x2e   :  { %189 = vmatmul.f32.vlgmr.msra.gmra.mxu2 %v73_v47  ;;  %207 = vmatpush.msra.mxu3 %v144_v50 }
  0x30   :  { %208 = vmatpush.msra.mxu3 %v142_v51 }
  0x31   :  { %209 = vmatmul.f32.vlgmr.msra.gmra.mxu3 %v73_v47 }
  0x90   :  { %v245_v16 = vpop.permute.xlu0 %244 }
  0x9d   :  { %v118_v54 = vpop.f32.mrf.mxu0 }
  0x9e   :  { %v119_v55 = vadd.f32 %v118_v54, %v93_v53 }
  0xa4   :  { %v138_v6 = vpop.f32.mrf.mxu1 }
  0xa5   :  { %v139_v11 = vadd.f32 %v138_v6, %v94_v5 }
  0xb1   :  { %v190_v56 = vpop.f32.mrf.mxu2 }
  0xb2   :  { %v213_v57 = vadd.f32 %v190_v56, %v119_v55 }
  0xb4   :  { %v270_v58 = vmul.f32 -1.442695, %v213_v57  ;;  %v210_v1 = vpop.f32.mrf.mxu3 }
  0xb5   :  { %v237_v8 = vadd.f32 %v279_v0, %v210_v1 }
  0xb6   :  { %280 = vpow2.f32 %v270_v58 }
  0xbc   :  { %v281_v59 = vpop.eup %280 }
  0xbd   :  { %v217_v60 = vadd.f32 1.0, %v281_v59 }
  0xbf   :  { %282 = vrcp.f32 %v217_v60  ;;  %v229_v2 = vand.u32 2147483648, %v217_v60  ;;  %v227_v4 = vand.u32 2147483647, %v217_v60  ;;  %vm223_vm2 = vweird.f32 %v217_v60 }
  0xc1   :  { %v230_v9 = vor.u32 1.1754944e-38, %v229_v2  ;;  %vm228_vm4 = vcmp.eq.f32.partialorder %v227_v4, 8.507059e+37 }
  0xc5   :  { %v283_v61 = vpop.eup %282 }
  0xc6   :  { %v219_v62 = vmul.f32 %v283_v61, %v217_v60  ;;  %vm224_vm1 = vweird.f32 %v283_v61 }
  0xc7   :  { %vm225_vm3 = vmor %vm223_vm2, %vm224_vm1 }
  0xc8   :  { %v220_v63 = vsub.f32 1.0, %v219_v62 }
  0xca   :  { %v221_v3 = vmul.f32 %v283_v61, %v220_v63 }
  0xcc   :  { %v222_v7 = vadd.f32 %v283_v61, %v221_v3 }
  0xce   :  { %v226_v10 = vsel %vm225_vm3, %v283_v61, %v222_v7 }
  0xcf   :  { %v231_v12 = vsel %vm228_vm4, %v230_v9, %v226_v10 }
  0xd0   :  { %v238_v13 = vmul.f32 %v237_v8, %v231_v12 }
  0xd2   :  { %v239_v14 = vadd.f32 %v238_v13, %v139_v11 }
  0xd4   :  { %284 = vtanh.f32 %v239_v14 }
  0xda   :  { %v285_v15 = vpop.eup %284 }
  0xdb   :  { %v241_v17 = vsub.f32 %v285_v15, %v73_v47 }
  0xdd   :  { %v247_v18 = vmul.f32 %v245_v16, %v241_v17 }
  0xdf   :  { %v248_v19 = vadd.f32 %v247_v18, %v73_v47 }
  0xe1   :  { %249 = vst [vmem:[#allocation8] sm:$0xff] %v248_v19 }
  0xe2   :  { %260 = dma.vmem_to_hbm [thread:$0]  %s256_s6, 128, %s258_s23, [#allocation4]  }
  0xe3   :  { %386 = dma.done.wait [#allocation4], 128  }
  0xe4   :  { %387 = vsyncadd [#allocation4], 4294967168 }
  0xe5   :  { %265 = vsyncpa [#allocation3], 1 }
  0xe6   :  { %266 = vsyncpa [#allocation6], 1 }
  0xe7   :  { %267 = vsyncpa [#allocation4], 1 }

</bundles_post_ra>
